<compile_context>
chip_gen: v7x
topology: tpu7x:2x2x1
jax: 0.10.0
libtpu: 0.0.40
codegen_flags: <defaults>
</compile_context>

<pallas_src>
import math
import jax
import jax.numpy as jnp
from jax.experimental import pallas as pl
from jax.experimental.pallas import tpu as pltpu


def mlp_kernel(xT_ref, w1_ref, b1_ref, w2_ref, b2_ref, w3_ref, b3_ref, oT_ref):
    xT = xT_ref[...]                                                     # (4, tb)

    # Layer 1: (12, 4) @ (4, tb) + (12, 1) -> ReLU
    h1 = jnp.dot(w1_ref[...], xT, preferred_element_type=jnp.float32) + b1_ref[...]
    h1 = jnp.maximum(h1, 0.0)                                            # (12, tb)

    # Layer 2: (8, 12) @ (12, tb) + (8, 1) -> ReLU
    h2 = jnp.dot(w2_ref[...], h1, preferred_element_type=jnp.float32) + b2_ref[...]
    h2 = jnp.maximum(h2, 0.0)                                            # (8, tb)

    # Layer 3: (2, 8) @ (8, tb) + (2, 1)
    out = jnp.dot(w3_ref[...], h2, preferred_element_type=jnp.float32) + b3_ref[...]
    oT_ref[...] = out.astype(oT_ref.dtype)                               # (2, tb), lane-dense store


def mlp_forward(x, params, tile_b=2048):
    """x: (B, 4) f32.  params: torch-layout (out,in) weights and (out,1) biases."""
    w1, b1, w2, b2, w3, b3 = params
    B, F = x.shape
    out_f = w3.shape[0]

    # Batch tile on the lane axis: multiple of 128; no padding of X needed —
    # Pallas masks the ragged final block (rows/columns are independent).
    tb = min(tile_b, pl.cdiv(B, 128) * 128)
    tb = max(128, (tb // 128) * 128)
    grid = (pl.cdiv(B, tb),)

    xT = x.T                                                             # (4, B)

    # Constant block index -> DMA'd once, VMEM-resident across grid steps.
    resident = lambda a: pl.BlockSpec(a.shape, lambda i: (0, 0))

    outT = pl.pallas_call(
        mlp_kernel,
        out_shape=jax.ShapeDtypeStruct((out_f, B), jnp.float32),
        grid=grid,
        in_specs=[
            pl.BlockSpec((F, tb), lambda i: (0, i)),     # X^T: streamed, batch in lanes
            resident(w1), resident(b1),
            resident(w2), resident(b2),
            resident(w3), resident(b3),
        ],
        out_specs=pl.BlockSpec((out_f, tb), lambda i: (0, i)),
        compiler_params=pltpu.CompilerParams(
            dimension_semantics=("parallel",),
        ),
    )(xT, w1, b1, w2, b2, w3, b3)

    return outT.T                                                        # (B, 2)


def xavier_uniform(key, fan_in, fan_out):
    # torch.nn.init.xavier_uniform_ on a (fan_out, fan_in) weight (torch layout).
    bound = math.sqrt(6.0 / (fan_in + fan_out))
    return jax.random.uniform(key, (fan_out, fan_in), jnp.float32, -bound, bound)


def linear_bias(key, fan_in, fan_out):
    # torch Linear default bias init: U(-1/sqrt(fan_in), 1/sqrt(fan_in)); stored
    # as (fan_out, 1) so it broadcasts over the lane (batch) axis in-kernel.
    bound = 1.0 / math.sqrt(fan_in)
    return jax.random.uniform(key, (fan_out, 1), jnp.float32, -bound, bound)


def init_params(key):
    k = jax.random.split(key, 6)
    w1 = xavier_uniform(k[0], 4, 12)
    b1 = linear_bias(k[1], 4, 12)
    w2 = xavier_uniform(k[2], 12, 8)
    b2 = linear_bias(k[3], 12, 8)
    w3 = xavier_uniform(k[4], 8, 2)
    b3 = linear_bias(k[5], 8, 2)
    return (w1, b1, w2, b2, w3, b3)


def mlp_reference(x, params):
    w1, b1, w2, b2, w3, b3 = params
    h = jnp.maximum(x @ w1.T + b1.T, 0.0)
    h = jnp.maximum(h @ w2.T + b2.T, 0.0)
    return h @ w3.T + b3.T


if __name__ == "__main__":
    key = jax.random.PRNGKey(0)
    pkey, xkey, xkey2 = jax.random.split(key, 3)

    params = init_params(pkey)

    # batch=70, 4 input features: exercises the ragged (70 < 128) single-step path.
    B = 70
    x = jax.random.normal(xkey, (B, 4), jnp.float32)

    out = jax.block_until_ready(mlp_forward(x, params))
    ref = mlp_reference(x, params)
    assert out.shape == (B, 2), out.shape
    assert jnp.allclose(out, ref, atol=1e-5), "mismatch vs reference"

    # batch=300 with tile_b=128: exercises a multi-step grid (3 steps, ragged tail).
    B2 = 300
    x2 = jax.random.normal(xkey2, (B2, 4), jnp.float32)
    out2 = jax.block_until_ready(mlp_forward(x2, params, tile_b=128))
    ref2 = mlp_reference(x2, params)
    assert out2.shape == (B2, 2), out2.shape
    assert jnp.allclose(out2, ref2, atol=1e-5), "mismatch vs reference (multi-tile)"

    print("KERNEL_OK")
</pallas_src>

<mosaic_0001>
module attributes {stable_mosaic.version = 11 : i64} {
  func.func @mlp_kernel(%arg0: i32, %arg1: memref<4x128xf32, #tpu.memory_space<vmem>>, %arg2: memref<12x4xf32, #tpu.memory_space<vmem>>, %arg3: memref<12x1xf32, #tpu.memory_space<vmem>>, %arg4: memref<8x12xf32, #tpu.memory_space<vmem>>, %arg5: memref<8x1xf32, #tpu.memory_space<vmem>>, %arg6: memref<2x8xf32, #tpu.memory_space<vmem>>, %arg7: memref<2x1xf32, #tpu.memory_space<vmem>>, %arg8: memref<2x128xf32, #tpu.memory_space<vmem>>) attributes {dimension_semantics = [#tpu.dimension_semantics<parallel>], iteration_bounds = array<i64: 1>, scalar_prefetch = 0 : i64, scratch_operands = 0 : i64, tpu.core_type = #tpu.core_type<tc>, window_params = [{transform_indices = @transform_0, window_bounds = array<i64: 4, 128>}, {pipeline_mode = #tpu.pipeline_mode<synchronous>, transform_indices = @transform_1, window_bounds = array<i64: 12, 4>}, {pipeline_mode = #tpu.pipeline_mode<synchronous>, transform_indices = @transform_2, window_bounds = array<i64: 12, 1>}, {pipeline_mode = #tpu.pipeline_mode<synchronous>, transform_indices = @transform_3, window_bounds = array<i64: 8, 12>}, {pipeline_mode = #tpu.pipeline_mode<synchronous>, transform_indices = @transform_4, window_bounds = array<i64: 8, 1>}, {pipeline_mode = #tpu.pipeline_mode<synchronous>, transform_indices = @transform_5, window_bounds = array<i64: 2, 8>}, {pipeline_mode = #tpu.pipeline_mode<synchronous>, transform_indices = @transform_6, window_bounds = array<i64: 2, 1>}, {transform_indices = @transform_7, window_bounds = array<i64: 2, 128>}]} {
    %c0 = arith.constant 0 : index
    %c0_0 = arith.constant 0 : index
    %0 = vector.load %arg1[%c0, %c0_0] : memref<4x128xf32, #tpu.memory_space<vmem>>, vector<4x128xf32>
    %c0_1 = arith.constant 0 : index
    %c0_2 = arith.constant 0 : index
    %1 = vector.load %arg2[%c0_1, %c0_2] : memref<12x4xf32, #tpu.memory_space<vmem>>, vector<12x4xf32>
    %cst = arith.constant dense<0.000000e+00> : vector<12x128xf32>
    %2 = tpu.matmul %1, %0, %cst {dimension_numbers = #tpu.dot_dimension_numbers<[1], [0], [0], [1], [0, 0, 1, 1], [], []>} : vector<12x4xf32>, vector<4x128xf32>, vector<12x128xf32> -> vector<12x128xf32>
    %c0_3 = arith.constant 0 : index
    %c0_4 = arith.constant 0 : index
    %3 = vector.load %arg3[%c0_3, %c0_4] : memref<12x1xf32, #tpu.memory_space<vmem>>, vector<12x1xf32>
    %4 = vector.broadcast %3 : vector<12x1xf32> to vector<12x128xf32>
    %5 = arith.addf %2, %4 : vector<12x128xf32>
    %cst_5 = arith.constant 0.000000e+00 : f32
    %6 = vector.broadcast %cst_5 : f32 to vector<12x128xf32>
    %7 = arith.maximumf %5, %6 : vector<12x128xf32>
    %c0_6 = arith.constant 0 : index
    %c0_7 = arith.constant 0 : index
    %8 = vector.load %arg4[%c0_6, %c0_7] : memref<8x12xf32, #tpu.memory_space<vmem>>, vector<8x12xf32>
    %cst_8 = arith.constant dense<0.000000e+00> : vector<8x128xf32>
    %9 = tpu.matmul %8, %7, %cst_8 {dimension_numbers = #tpu.dot_dimension_numbers<[1], [0], [0], [1], [0, 0, 1, 1], [], []>} : vector<8x12xf32>, vector<12x128xf32>, vector<8x128xf32> -> vector<8x128xf32>
    %c0_9 = arith.constant 0 : index
    %c0_10 = arith.constant 0 : index
    %10 = vector.load %arg5[%c0_9, %c0_10] : memref<8x1xf32, #tpu.memory_space<vmem>>, vector<8x1xf32>
    %11 = vector.broadcast %10 : vector<8x1xf32> to vector<8x128xf32>
    %12 = arith.addf %9, %11 : vector<8x128xf32>
    %cst_11 = arith.constant 0.000000e+00 : f32
    %13 = vector.broadcast %cst_11 : f32 to vector<8x128xf32>
    %14 = arith.maximumf %12, %13 : vector<8x128xf32>
    %c0_12 = arith.constant 0 : index
    %c0_13 = arith.constant 0 : index
    %15 = vector.load %arg6[%c0_12, %c0_13] : memref<2x8xf32, #tpu.memory_space<vmem>>, vector<2x8xf32>
    %cst_14 = arith.constant dense<0.000000e+00> : vector<2x128xf32>
    %16 = tpu.matmul %15, %14, %cst_14 {dimension_numbers = #tpu.dot_dimension_numbers<[1], [0], [0], [1], [0, 0, 1, 1], [], []>} : vector<2x8xf32>, vector<8x128xf32>, vector<2x128xf32> -> vector<2x128xf32>
    %c0_15 = arith.constant 0 : index
    %c0_16 = arith.constant 0 : index
    %17 = vector.load %arg7[%c0_15, %c0_16] : memref<2x1xf32, #tpu.memory_space<vmem>>, vector<2x1xf32>
    %18 = vector.broadcast %17 : vector<2x1xf32> to vector<2x128xf32>
    %19 = arith.addf %16, %18 : vector<2x128xf32>
    %c0_17 = arith.constant 0 : index
    %c0_18 = arith.constant 0 : index
    %20 = vector.load %arg8[%c0_17, %c0_18] : memref<2x128xf32, #tpu.memory_space<vmem>>, vector<2x128xf32>
    tpu.vector_store %arg8[%c0_17, %c0_18], %19 {strides = array<i32>} : memref<2x128xf32, #tpu.memory_space<vmem>>, vector<2x128xf32>,
    return
  }
  func.func @transform_0(%arg0: i32) -> (i32, i32) {
    %c0_i32 = arith.constant 0 : i32
    %c0_i32_0 = arith.constant 0 : i32
    return %c0_i32, %arg0 : i32, i32
  }
  func.func @transform_1(%arg0: i32) -> (i32, i32) {
    %c0_i32 = arith.constant 0 : i32
    %c0_i32_0 = arith.constant 0 : i32
    %c0_i32_1 = arith.constant 0 : i32
    return %c0_i32, %c0_i32_0 : i32, i32
  }
  func.func @transform_2(%arg0: i32) -> (i32, i32) {
    %c0_i32 = arith.constant 0 : i32
    %c0_i32_0 = arith.constant 0 : i32
    %c0_i32_1 = arith.constant 0 : i32
    return %c0_i32, %c0_i32_0 : i32, i32
  }
  func.func @transform_3(%arg0: i32) -> (i32, i32) {
    %c0_i32 = arith.constant 0 : i32
    %c0_i32_0 = arith.constant 0 : i32
    %c0_i32_1 = arith.constant 0 : i32
    return %c0_i32, %c0_i32_0 : i32, i32
  }
  func.func @transform_4(%arg0: i32) -> (i32, i32) {
    %c0_i32 = arith.constant 0 : i32
    %c0_i32_0 = arith.constant 0 : i32
    %c0_i32_1 = arith.constant 0 : i32
    return %c0_i32, %c0_i32_0 : i32, i32
  }
  func.func @transform_5(%arg0: i32) -> (i32, i32) {
    %c0_i32 = arith.constant 0 : i32
    %c0_i32_0 = arith.constant 0 : i32
    %c0_i32_1 = arith.constant 0 : i32
    return %c0_i32, %c0_i32_0 : i32, i32
  }
  func.func @transform_6(%arg0: i32) -> (i32, i32) {
    %c0_i32 = arith.constant 0 : i32
    %c0_i32_0 = arith.constant 0 : i32
    %c0_i32_1 = arith.constant 0 : i32
    return %c0_i32, %c0_i32_0 : i32, i32
  }
  func.func @transform_7(%arg0: i32) -> (i32, i32) {
    %c0_i32 = arith.constant 0 : i32
    %c0_i32_0 = arith.constant 0 : i32
    return %c0_i32, %arg0 : i32, i32
  }
}

</mosaic_0001>

<bundles_post_ra>
// kernel: tpu_custom_call.1
= control target key start
LH: loop header
LB: loop body
LE: loop exit
PB: predicated region body
PF: predicated region fallthrough
CT: control target
= control target key end

     0   :  { %vm49_vm0 = vcmask 1043456   ;;  %vm42_vm1 = vcmask 31744   ;;  %v378_v4 = vmov 0   ;;  %s466_s0 = inlined_call_operand.vmem [shape: f32[4,70], index: 0, kind: input, shape index: {}]   ;;  %s467_s1 = inlined_call_operand.vmem [shape: f32[12,4], index: 1, kind: input, shape index: {}]   ;;  %s468_s2 = inlined_call_operand.vmem [shape: f32[12,1], index: 2, kind: input, shape index: {}]   ;;  %s469_s3 = inlined_call_operand.vmem [shape: f32[8,12], index: 3, kind: input, shape index: {}]   ;;  %s470_s4 = inlined_call_operand.vmem [shape: f32[8,1], index: 4, kind: input, shape index: {}]   ;;  %s471_s5 = inlined_call_operand.vmem [shape: f32[2,8], index: 5, kind: input, shape index: {}]   ;;  %s472_s6 = inlined_call_operand.vmem [shape: f32[2,1], index: 6, kind: input, shape index: {}]   ;;  %s473_s7 = inlined_call_operand.hbm [shape: f32[2,70], index: 7, kind: output, shape index: {}]  }
   0x1   :  { %v27_v0 = vld [vmem:[%s466_s0] sm:$0xf]  ;;  %v29_v2 = vld [vmem:[%s467_s1 + $0x8] sm:$0xf]  ;;  %352 = vset.pattern.permute.xlu0 %v378_v4 }
   0x2   :  { %v28_v1 = vld [vmem:[%s467_s1] sm:$0xff]  ;;  %325 = vmatprep.subr.msk.mxu0 %vm49_vm0, %v27_v0 }
   0x3   :  { %327 = vmatprep.mubr.msk.f32.mxu0 %vm42_vm1, %v28_v1  ;;  %v30_v3 = vld [vmem:[%s468_s2] sm:$0xff]  ;;  %326 = vmatpush3.msk.msra.mxu0 %vm49_vm0, %v27_v0 }
   0x4   :  { %12 = vsyncpa [#allocation3], 0  ;;  %328 = vmatmul.mubr.msk.f32.vlgmr.msra.gmra.mrb[0].mxu0 %vm42_vm1, %v29_v2  ;;  %34 = vperm.xlu0 %352, %v30_v3   ;;  %v31_v5 = vld [vmem:[%s468_s2 + $0x8] sm:$0xf]  ;;  %v379_v6 = vmov 0.0|0.0   ;;  %vm380_vm2 = vmmov 0  }
   0x5   :  { %353 = vset.pattern.permute.xlu1 %v378_v4  ;;  %342 = vmatprep.subr.bf16.mxu1 %v379_v6  ;;  %v381_v7 = vmov 0.0   ;;  %v131_v8 = vld [vmem:[%s470_s4] sm:$0xff]  ;;  %vm382_vm3 = vmmov 1   ;;  %vm137_vm5 = vcmask 97280   ;;  %vm222_vm6 = vcmask 64512   ;;  %s383_s14 = smov [#allocation2]  }
   0x6   :  { %334 = vmatprep.mubr.msk.f32.mxu1 %vm380_vm2, %v381_v7  ;;  %337 = vmatprep.subr.mxu0 %v381_v7  ;;  %v216_v9 = vld [vmem:[%s472_s6] sm:$0x3]  ;;  %vm344_vm4 = vmpackc.low %vm49_vm0, %vm382_vm3  ;;  %s303_s15 = sshll.u32 %s383_s14, 4  ;;  %s304_s15 = int_to_ptr.vmem [resolvable:$true] %s303_s15 }
   0x7   :  { %339 = vmatprep.mubr.msk.f32.mxu0 %vm380_vm2, %v381_v7  ;;  %134 = vperm.xlu1 %353, %v131_v8   ;;  %v130_v19 = vld [vmem:[%s469_s3] sm:$0xff]  ;;  %s354_s3 = scalar_lea.vmem %s304_s15, 32  ;;  %p359_p1 = scmp.lt.s32.totalorder %s304_s15, %s304_s15 }
   0x8   :  { %39 = vperm.xlu0 %352, %v31_v5   ;;  %v215_v25 = vld [vmem:[%s471_s5] sm:$0x3]  ;;  %p355_p0 = scmp.ne.s32.totalorder %s304_s15, %s354_s3  ;;  %p360_p2 = scmp.lt.s32.totalorder %s354_s3, %s354_s3 }
   0xa   :  { %p361_p3 = por %p360_p2, %p359_p1 }
   0xb   :  { %219 = vperm.xlu1 %353, %v216_v9  }
   0xc   :  { %p362_p4 = pnand %p361_p3, %p355_p0 }
  0x83   :  { %v35_v10 = vpop.permute.xlu0 %34 }
  0x86   :  { %v135_v20 = vpop.permute.xlu1 %134 }
  0x87   :  { %v40_v11 = vpop.permute.xlu0 %39 }
  0x8a   :  { %v220_v26 = vpop.permute.xlu1 %219 }
  0xd7   :  { %v329_v12 = vpop.f32.mrb[0].mxu0 }
  0xd8   :  { %v125_v13 = vadd.f32 %v329_v12, %v40_v11  ;;  %v119_v14 = vpop.f32.mrb[1].mxu0 }
  0xd9   :  { %v120_v15 = vadd.f32 %v119_v14, %v35_v10 }
  0xda   :  { %v129_v16 = vmax.f32 %v125_v13, 0.0 }
  0xdb   :  { %v128_v17 = vmax.f32 %v120_v15, 0.0 }
  0xdd   :  { %v343_v18 = vpack.c.bf16 %v129_v16, %v128_v17 }
  0xdf   :  { %345 = vmatpush3.bf16.msk.msra.mxu1 %vm344_vm4, %v343_v18 }
  0xe2   :  { %335 = vmatmul.mubr.msk.f32.vlgmr.msra.gmra.mrb[0].mxu1 %vm137_vm5, %v130_v19 }
 0x1b5   :  { %v210_v21 = vpop.f32.mrb[0].mxu1 }
 0x1b6   :  { %v211_v22 = vadd.f32 %v210_v21, %v135_v20  ;;  %v336_v23 = vpop.f32.mrb[1].mxu1 }
 0x1b8   :  { %v214_v24 = vmax.f32 %v211_v22, 0.0 }
 0x1ba   :  { %338 = vmatpush3.msra.mxu0 %v214_v24 }
 0x1bb   :  { %340 = vmatmul.mubr.msk.f32.vlgmr.msra.gmra.mrb[2].mxu0 %vm222_vm6, %v215_v25 }
 0x28e   :  { %v292_v27 = vpop.f32.mrb[2].mxu0 }
 0x28f   :  { %v293_v28 = vadd.f32 %v292_v27, %v220_v26  ;;  %v341_v29 = vpop.f32.mrb[3].mxu0 }
 0x291   :  { %296 = vst [vmem:[#allocation2] sm:$0x3] %v293_v28 }
 0x292   :  { %365 = shalt.err (!%p362_p4)
}
 0x293   :  { %s366_s17 = scalar_lea.hbm %s473_s7, 32 }
 0x294   :  { %p367_p5 = scmp.ne.s32.totalorder %s473_s7, %s366_s17  ;;  %p370_p6 = scmp.lt.u32.totalorder %s366_s17, %s473_s7 }
 0x296   :  { %p372_p7 = pnand %p370_p6, %p367_p5 }
 0x298   :  { %375 = shalt.err (!%p372_p7)
}
 0x299   :  { %306 = dma.vmem_to_hbm [thread:$0]  %s304_s15, 32, %s473_s7, [#allocation3]  }
 0x29a   :  { %376 = dma.done.wait [#allocation3], 32  }
 0x29b   :  { %377 = vsyncadd [#allocation3], 4294967264 }
 0x29c   :  { %310 = vsyncpa [#allocation3], 1 }

</bundles_post_ra>
